<compile_context>
chip_gen: v5e
topology: v5e:2x2
jax: 0.10.0
libtpu: 0.0.40
codegen_flags: <defaults>
</compile_context>

<pallas_src>
import jax
import jax.numpy as jnp
from jax.experimental import pallas as pl
from jax.experimental.pallas import tpu as pltpu


# ----------------------------- Pallas kernel --------------------------------
def make_critic_kernel(B, N, off, dims):
    """Builds the kernel with all shape constants / slab offsets baked in."""
    F, S, A, H1, H2 = dims['F'], dims['S'], dims['A'], dims['H1'], dims['H2']
    BN = B * N

    def kernel(act_ref, a_ref, w_ref, out_ref):
        # ---- unpack activation slab (static ref slices, sublane-aligned) ----
        adj_bd = act_ref[0:BN, 0:BN]          # [BN, BN] block-diagonal A-hat
        x_flat = act_ref[BN:2 * BN, 0:F]      # [BN, F]
        adj_m = act_ref[2 * BN:3 * BN, 0:1]   # [BN, 1]  (1/N) column sums of A
        a = a_ref[...]                        # [B, A]

        # ---- unpack weight slab ---------------------------------------------
        wg1 = w_ref[off['wg1']:off['wg1'] + F, 0:S]            # [F, S]
        bg1 = w_ref[off['bg1']:off['bg1'] + 1, 0:S]            # [1, S]
        wcat = w_ref[off['wcat']:off['wcat'] + S + A, 0:H1]    # [S+A, H1]
        bcat = w_ref[off['bcat']:off['bcat'] + 1, 0:H1]        # [1, H1]
        w2 = w_ref[off['w2']:off['w2'] + H1, 0:H2]             # [H1, H2]
        b2 = w_ref[off['b2']:off['b2'] + 1, 0:H2]              # [1, H2]
        w3 = w_ref[off['w3']:off['w3'] + 1, 0:H2]              # [1, H2] (fc3 row)
        b3 = w_ref[off['b3']:off['b3'] + 1, 0:1]               # [1, 1]

        # ---- GCN layer 1: relu((A_bd @ X) @ Wg1 + bg1) ----------------------
        ax = jnp.dot(adj_bd, x_flat, preferred_element_type=jnp.float32)   # [BN,F]
        h = jnp.dot(ax, wg1, preferred_element_type=jnp.float32) + bg1     # [BN,S]
        h = jnp.maximum(h, 0.0)

        # ---- readout r[b,s] = sum_m adj_mean[b,m] * h[b,m,s]  (VPU + XLU) ---
        r = jnp.sum((adj_m * h).reshape(B, N, S), axis=1)                  # [B, S]

        # ---- fused (GCN layer2 -> fc11) + fc12:  relu([r|a] @ Wcat + bcat) --
        ga = jnp.concatenate([r, a], axis=-1)                              # [B,S+A]
        out = jnp.dot(ga, wcat, preferred_element_type=jnp.float32) + bcat
        out = jnp.maximum(out, 0.0)                                        # [B, H1]

        # ---- fc2 + relu ------------------------------------------------------
        out = jnp.dot(out, w2, preferred_element_type=jnp.float32) + b2
        out = jnp.maximum(out, 0.0)                                        # [B, H2]

        # ---- fc3 on the VPU (mul + lane reduce) + tanh -> [B, 1] -------------
        q = jnp.sum(out * w3, axis=-1, keepdims=True) + b3
        out_ref[...] = jnp.tanh(q)

    return kernel


# ---------------------- one-time parameter packing ---------------------------
def prepare_params(params):
    """Folds GCN layer2 into fc11 and packs everything into one weight slab.

    Call once; the result is reused across every forward call."""
    F, S = params['wg1'].shape
    A = params['w12'].shape[0]
    H1 = params['w11'].shape[1]
    H2 = params['w2'].shape[1]

    # g = r @ Wg2 + bg2 ; fc11(g) + fc12(a) = [r|a] @ [[Wg2@W11],[W12]] + b_cat
    w_fold = params['wg2'] @ params['w11']                                 # [S, H1]
    w_cat = jnp.concatenate([w_fold, params['w12']], axis=0)               # [S+A, H1]
    b_cat = params['bg2'] @ params['w11'] + params['b11'] + params['b12']  # [1, H1]
    w3_row = params['w3'].T                                                # [1, H2]

    def align8(r):
        return (r + 7) & ~7

    off = {}
    r = 0
    off['wg1'] = r; r = align8(r + F)
    off['wcat'] = r; r = align8(r + S + A)
    off['w2'] = r; r = align8(r + H1)
    off['w3'] = r; r += 1
    off['bg1'] = r; r += 1
    off['bcat'] = r; r += 1
    off['b2'] = r; r += 1
    off['b3'] = r; r += 1
    rows = align8(r)

    slab = jnp.zeros((rows, 128), jnp.float32)

    def put(s, r0, arr):
        return s.at[r0:r0 + arr.shape[0], 0:arr.shape[1]].set(arr)

    slab = put(slab, off['wg1'], params['wg1'])
    slab = put(slab, off['wcat'], w_cat)
    slab = put(slab, off['w2'], params['w2'])
    slab = put(slab, off['w3'], w3_row)
    slab = put(slab, off['bg1'], params['bg1'])
    slab = put(slab, off['bcat'], b_cat)
    slab = put(slab, off['b2'], params['b2'])
    slab = put(slab, off['b3'], params['b3'])

    dims = {'F': F, 'S': S, 'A': A, 'H1': H1, 'H2': H2}
    return slab, off, dims


# ------------------------------ wrapper --------------------------------------
def critic_forward(x, adj, a, prep):
    """Whole critic forward in a single gridless Pallas kernel (3 input DMAs)."""
    slab, off, dims = prep
    B, N, F = x.shape
    BN = B * N
    W = max(BN, F)

    # Per-call activation packing (ideally fused upstream where adj is made):
    #   rows [0,BN)      lanes [0,BN) : block-diagonal adjacency
    #   rows [BN,2BN)    lanes [0,F)  : flattened node features
    #   rows [2BN,3BN)   lanes [0,1)  : adjacency column means (readout weights)
    adj_bd = (jnp.eye(B, dtype=jnp.float32)[:, None, :, None]
              * adj[:, :, None, :]).reshape(BN, BN)
    adj_m = jnp.mean(adj, axis=1).reshape(BN, 1)
    act = jnp.zeros((3 * BN, W), jnp.float32)
    act = act.at[0:BN, 0:BN].set(adj_bd)
    act = act.at[BN:2 * BN, 0:F].set(x.reshape(BN, F))
    act = act.at[2 * BN:3 * BN, 0:1].set(adj_m)

    kernel = make_critic_kernel(B, N, off, dims)
    vmem = pl.BlockSpec(memory_space=pltpu.MemorySpace.VMEM)
    S, A, H1, H2 = dims['S'], dims['A'], dims['H1'], dims['H2']
    cost = pl.CostEstimate(
        flops=2 * (BN * BN * F + BN * F * S + B * (S + A) * H1
                   + B * H1 * H2 + B * H2),
        transcendentals=B,
        bytes_accessed=4 * (act.size + a.size + slab.size + B),
    )
    return pl.pallas_call(
        kernel,
        out_shape=jax.ShapeDtypeStruct((B, 1), jnp.float32),
        in_specs=[vmem, vmem, vmem],
        out_specs=vmem,
        cost_estimate=cost,
    )(act, a, slab)


# --------------------------- pure-JAX reference ------------------------------
def critic_reference(x, adj, a, p):
    h = jnp.maximum(jnp.einsum('bnm,bmf,fs->bns', adj, x, p['wg1']) + p['bg1'], 0.0)
    h2 = jnp.einsum('bnm,bms,st->bnt', adj, h, p['wg2']) + p['bg2']
    g = jnp.mean(h2, axis=1)
    out = jnp.maximum(g @ p['w11'] + p['b11'] + a @ p['w12'] + p['b12'], 0.0)
    out = jnp.maximum(out @ p['w2'] + p['b2'], 0.0)
    return jnp.tanh(out @ p['w3'] + p['b3'])


# --------------------------- deterministic init -------------------------------
def init_params(key, node_feature_size, nb_states, nb_actions, hidden1, hidden2):
    def linear(k, fan_in, fan_out):
        kw, kb = jax.random.split(k)
        bound = 1.0 / jnp.sqrt(fan_in)
        w = jax.random.uniform(kw, (fan_in, fan_out), jnp.float32, -bound, bound)
        b = jax.random.uniform(kb, (1, fan_out), jnp.float32, -bound, bound)
        return w, b

    ks = jax.random.split(key, 6)
    wg1, bg1 = linear(ks[0], node_feature_size, nb_states)
    wg2, bg2 = linear(ks[1], nb_states, nb_states)
    w11, b11 = linear(ks[2], nb_states, hidden1)
    w12, b12 = linear(ks[3], nb_actions, hidden1)
    w2, b2 = linear(ks[4], hidden1, hidden2)
    w3, b3 = linear(ks[5], hidden2, 1)
    return {
        'wg1': wg1, 'bg1': bg1,
        'wg2': wg2, 'bg2': bg2,
        'w11': w11, 'b11': b11,
        'w12': w12, 'b12': b12,
        'w2': w2, 'b2': b2,
        'w3': w3, 'b3': b3,
    }


# --------------------------------- main ---------------------------------------
if __name__ == "__main__":
    # small, module-consistent shapes
    B, N = 2, 8                     # batch, number of graph nodes
    node_feature_size = 4
    nb_states = 16
    nb_actions = 4
    hidden1, hidden2 = 64, 32

    key = jax.random.PRNGKey(0)
    k_x, k_adj, k_a, k_p = jax.random.split(key, 4)

    x = jax.random.normal(k_x, (B, N, node_feature_size), jnp.float32)
    a = jax.random.normal(k_a, (B, nb_actions), jnp.float32)

    # random symmetric adjacency with self-loops, row-normalized (A-hat)
    raw = jax.random.bernoulli(k_adj, 0.4, (B, N, N)).astype(jnp.float32)
    sym = jnp.maximum(raw, jnp.swapaxes(raw, 1, 2))
    adj = sym + jnp.eye(N, dtype=jnp.float32)[None]
    adj = adj / jnp.sum(adj, axis=-1, keepdims=True)

    params = init_params(k_p, node_feature_size, nb_states, nb_actions,
                         hidden1, hidden2)
    prep = prepare_params(params)           # one-time packing / folding

    out = critic_forward(x, adj, a, prep)
    out = jax.block_until_ready(out)

    ref = critic_reference(x, adj, a, params)
    assert out.shape == (B, 1), out.shape
    assert jnp.allclose(out, ref, atol=1e-5, rtol=1e-5), (out, ref)

    print("KERNEL_OK")
</pallas_src>

<mosaic_0001>
module attributes {stable_mosaic.version = 11 : i64} {
  func.func @kernel(%arg0: memref<48x16xf32, #tpu.memory_space<vmem>>, %arg1: memref<2x4xf32, #tpu.memory_space<vmem>>, %arg2: memref<104x128xf32, #tpu.memory_space<vmem>>, %arg3: memref<2x1xf32, #tpu.memory_space<vmem>>) attributes {dimension_semantics = [], scalar_prefetch = 0 : i64, scratch_operands = 0 : i64, tpu.core_type = #tpu.core_type<tc>} {
    %c0 = arith.constant 0 : index
    %c0_0 = arith.constant 0 : index
    %0 = vector.load %arg0[%c0, %c0_0] : memref<48x16xf32, #tpu.memory_space<vmem>>, vector<16x16xf32>
    %c16 = arith.constant 16 : index
    %c0_1 = arith.constant 0 : index
    %1 = vector.load %arg0[%c16, %c0_1] : memref<48x16xf32, #tpu.memory_space<vmem>>, vector<16x4xf32>
    %c32 = arith.constant 32 : index
    %c0_2 = arith.constant 0 : index
    %2 = vector.load %arg0[%c32, %c0_2] : memref<48x16xf32, #tpu.memory_space<vmem>>, vector<16x1xf32>
    %c0_3 = arith.constant 0 : index
    %c0_4 = arith.constant 0 : index
    %3 = vector.load %arg1[%c0_3, %c0_4] : memref<2x4xf32, #tpu.memory_space<vmem>>, vector<2x4xf32>
    %c0_5 = arith.constant 0 : index
    %c0_6 = arith.constant 0 : index
    %4 = vector.load %arg2[%c0_5, %c0_6] : memref<104x128xf32, #tpu.memory_space<vmem>>, vector<4x16xf32>
    %c97 = arith.constant 97 : index
    %c0_7 = arith.constant 0 : index
    %5 = vector.load %arg2[%c97, %c0_7] : memref<104x128xf32, #tpu.memory_space<vmem>>, vector<1x16xf32>
    %c8 = arith.constant 8 : index
    %c0_8 = arith.constant 0 : index
    %6 = vector.load %arg2[%c8, %c0_8] : memref<104x128xf32, #tpu.memory_space<vmem>>, vector<20x64xf32>
    %c98 = arith.constant 98 : index
    %c0_9 = arith.constant 0 : index
    %7 = vector.load %arg2[%c98, %c0_9] : memref<104x128xf32, #tpu.memory_space<vmem>>, vector<1x64xf32>
    %c32_10 = arith.constant 32 : index
    %c0_11 = arith.constant 0 : index
    %8 = vector.load %arg2[%c32_10, %c0_11] : memref<104x128xf32, #tpu.memory_space<vmem>>, vector<64x32xf32>
    %c99 = arith.constant 99 : index
    %c0_12 = arith.constant 0 : index
    %9 = vector.load %arg2[%c99, %c0_12] : memref<104x128xf32, #tpu.memory_space<vmem>>, vector<1x32xf32>
    %c96 = arith.constant 96 : index
    %c0_13 = arith.constant 0 : index
    %10 = vector.load %arg2[%c96, %c0_13] : memref<104x128xf32, #tpu.memory_space<vmem>>, vector<1x32xf32>
    %c100 = arith.constant 100 : index
    %c0_14 = arith.constant 0 : index
    %11 = vector.load %arg2[%c100, %c0_14] : memref<104x128xf32, #tpu.memory_space<vmem>>, vector<1x1xf32>
    %cst = arith.constant dense<0.000000e+00> : vector<16x4xf32>
    %12 = tpu.matmul %0, %1, %cst {dimension_numbers = #tpu.dot_dimension_numbers<[1], [0], [0], [1], [0, 0, 1, 1], [], []>} : vector<16x16xf32>, vector<16x4xf32>, vector<16x4xf32> -> vector<16x4xf32>
    %cst_15 = arith.constant dense<0.000000e+00> : vector<16x16xf32>
    %13 = tpu.matmul %12, %4, %cst_15 {dimension_numbers = #tpu.dot_dimension_numbers<[1], [0], [0], [1], [0, 0, 1, 1], [], []>} : vector<16x4xf32>, vector<4x16xf32>, vector<16x16xf32> -> vector<16x16xf32>
    %14 = vector.broadcast %5 : vector<1x16xf32> to vector<16x16xf32>
    %15 = arith.addf %13, %14 : vector<16x16xf32>
    %cst_16 = arith.constant 0.000000e+00 : f32
    %16 = vector.broadcast %cst_16 : f32 to vector<16x16xf32>
    %17 = arith.maximumf %15, %16 : vector<16x16xf32>
    %18 = vector.broadcast %2 : vector<16x1xf32> to vector<16x16xf32>
    %19 = arith.mulf %18, %17 : vector<16x16xf32>
    %20 = vector.shape_cast %19 : vector<16x16xf32> to vector<2x8x16xf32>
    %cst_17 = arith.constant dense<0.000000e+00> : vector<2x16xf32>
    %21 = vector.multi_reduction <add>, %20, %cst_17 [1] : vector<2x8x16xf32> to vector<2x16xf32>
    %22 = tpu.concatenate %21, %3 in 1 : vector<2x16xf32>, vector<2x4xf32> -> vector<2x20xf32>
    %cst_18 = arith.constant dense<0.000000e+00> : vector<2x64xf32>
    %23 = tpu.matmul %22, %6, %cst_18 {dimension_numbers = #tpu.dot_dimension_numbers<[1], [0], [0], [1], [0, 0, 1, 1], [], []>} : vector<2x20xf32>, vector<20x64xf32>, vector<2x64xf32> -> vector<2x64xf32>
    %24 = vector.broadcast %7 : vector<1x64xf32> to vector<2x64xf32>
    %25 = arith.addf %23, %24 : vector<2x64xf32>
    %cst_19 = arith.constant 0.000000e+00 : f32
    %26 = vector.broadcast %cst_19 : f32 to vector<2x64xf32>
    %27 = arith.maximumf %25, %26 : vector<2x64xf32>
    %cst_20 = arith.constant dense<0.000000e+00> : vector<2x32xf32>
    %28 = tpu.matmul %27, %8, %cst_20 {dimension_numbers = #tpu.dot_dimension_numbers<[1], [0], [0], [1], [0, 0, 1, 1], [], []>} : vector<2x64xf32>, vector<64x32xf32>, vector<2x32xf32> -> vector<2x32xf32>
    %29 = vector.broadcast %9 : vector<1x32xf32> to vector<2x32xf32>
    %30 = arith.addf %28, %29 : vector<2x32xf32>
    %cst_21 = arith.constant 0.000000e+00 : f32
    %31 = vector.broadcast %cst_21 : f32 to vector<2x32xf32>
    %32 = arith.maximumf %30, %31 : vector<2x32xf32>
    %33 = vector.broadcast %10 : vector<1x32xf32> to vector<2x32xf32>
    %34 = arith.mulf %32, %33 : vector<2x32xf32>
    %cst_22 = arith.constant dense<0.000000e+00> : vector<2xf32>
    %35 = vector.multi_reduction <add>, %34, %cst_22 [1] : vector<2x32xf32> to vector<2xf32>
    %36 = vector.shape_cast %35 : vector<2xf32> to vector<2x1xf32>
    %37 = vector.broadcast %11 : vector<1x1xf32> to vector<2x1xf32>
    %38 = arith.addf %36, %37 : vector<2x1xf32>
    %39 = math.tanh %38 : vector<2x1xf32>
    %c0_23 = arith.constant 0 : index
    %c0_24 = arith.constant 0 : index
    %40 = vector.load %arg3[%c0_23, %c0_24] : memref<2x1xf32, #tpu.memory_space<vmem>>, vector<2x1xf32>
    tpu.vector_store %arg3[%c0_23, %c0_24], %39 {strides = array<i32>} : memref<2x1xf32, #tpu.memory_space<vmem>>, vector<2x1xf32>,
    return
  }
}

</mosaic_0001>

<bundles_post_ra>
// kernel: tpu_custom_call.1
= control target key start
LH: loop header
LB: loop body
LE: loop exit
PB: predicated region body
PF: predicated region fallthrough
CT: control target
= control target key end

     0   :  { %8 = vsyncpa [#allocation3], 0  ;;  %s275_s15 = smov [#allocation2]   ;;  %s276_s17 = smov 128   ;;  %s334_s0 = inlined_call_operand.vmem [shape: f32[48,16], index: 0, kind: input, shape index: {}]   ;;  %s335_s1 = inlined_call_operand.vmem [shape: f32[2,4], index: 1, kind: input, shape index: {}]   ;;  %s336_s2 = inlined_call_operand.hbm [shape: f32[104,128], index: 2, kind: input, shape index: {}]   ;;  %s337_s3 = inlined_call_operand.vmem [shape: f32[2,1], index: 3, kind: output, shape index: {}]  }
   0x1   :  { %s17_s14 = sshll.u32 %s336_s2, 4  ;;  %s19_s16 = sshll.u32 %s275_s15, 4  ;;  %s18_s14 = int_to_ptr.hbm [resolvable:$true] %s17_s14  ;;  %s20_s16 = int_to_ptr.vmem [resolvable:$true] %s19_s16 }
   0x2   :  { %s277_s18 = smov 8  }
   0x3   :  { %25 = dma.hbm_to_vmem [thread:$0]  %s18_s14, 1664, %s20_s16, [#allocation3], %s276_s17, %s276_s17, %s277_s18  }
   0x4   :  { %273 = dma.done.wait [#allocation3], 1664  }
   0x5   :  { %274 = vsyncadd [#allocation3], 4294965632  ;;  %v33_v0 = vld [vmem:[%s334_s0 + $0x18] sm:$0xff]  ;;  %v32_v1 = vld [vmem:[%s334_s0 + $0x10] sm:$0xff]  ;;  %vm54_vm0 = vcmask 130048   ;;  %vm92_vm1 = vcmask 1043456  }
   0x6   :  { %75 = vmatpush.msra.mxu0 %v33_v0  ;;  %v30_v2 = vld [vmem:[%s334_s0] sm:$0xff]  ;;  %v31_v3 = vld [vmem:[%s334_s0 + $0x8] sm:$0xff]  ;;  %v278_v6 = vmov 0   ;;  %s279_s5 = smov 16   ;;  %vm85_vm2 = vcmask 31744   ;;  %v40_v12 = vld [vmem:[#allocation2 + $0x10] sm:$0xff] }
   0x7   :  { %v37_v4 = vld [vmem:[#allocation2] sm:$0xf]  ;;  %241 = vset.pattern.permute.xlu0 %v278_v6  ;;  %v35_v7 = vld [vmem:[%s334_s0 + $0x28] sm:$0xff]  ;;  %v41_v11 = vld [vmem:[#allocation2 + $0x18] sm:$0xf]  ;;  %vm149_vm3 = vcmask 1041409  }
   0x8   :  { %76 = vmatpush.msra.mxu0 %v32_v1  ;;  %230 = vmatpush.msk.msra.mxu1 %vm92_vm1, %v37_v4  ;;  %v34_v5 = vld [vmem:[%s334_s0 + $0x20] sm:$0xff]  ;;  %v39_v13 = vld [vmem:[#allocation2 + $0x8] sm:$0xff]  ;;  %v50_v15 = vld [vmem:[#allocation2 + $0x58] sm:$0xff]  ;;  %vm158_vm4 = vcmask 162816   ;;  %vm187_vm5 = vcmask 523264   ;;  %vm214_vm6 = vcmask 254976  }
   0x9   :  { %228 = vmatmul.msk.f32.vlgmr.msra.gmra.mxu0 %vm54_vm0, %v30_v2  ;;  %123 = vperm.xlu0 %241, %v34_v5   ;;  %v36_v8 = vld [vmem:[%s335_s1] sm:$0x3]  ;;  %v49_v16 = vld [vmem:[#allocation2 + $0x50] sm:$0xff]  ;;  %v48_v18 = vld [vmem:[#allocation2 + $0x48] sm:$0xff]  ;;  %vm221_vm7 = vcmask 1024  }
   0xa   :  { %153 = vrot.lane.b32.xlu1 %v36_v8, %s279_s5  ;;  %233 = vmatpush.msk.msra.mxu2 %vm92_vm1, %v41_v11  ;;  %v242_v14 = vld [vmem:[#allocation2 + $0x61] ss:$0 sm:$0xff]  ;;  %v46_v23 = vld [vmem:[#allocation2 + $0x38] sm:$0xff]  ;;  %v45_v47 = vld [vmem:[#allocation2 + $0x30] sm:$0xff] }
   0xb   :  { %199 = vmatpush.msra.mxu3 %v50_v15  ;;  %v47_v21 = vld [vmem:[#allocation2 + $0x40] sm:$0xff]  ;;  %v44_v48 = vld [vmem:[#allocation2 + $0x28] sm:$0xff] }
   0xc   :  { %179 = vmatpush.msra.mxu2 %v40_v12  ;;  %v43_v49 = vld [vmem:[#allocation2 + $0x20] sm:$0xff] }
   0xd   :  { %200 = vmatpush.msra.mxu3 %v49_v16  ;;  %v243_v50 = vld [vmem:[#allocation2 + $0x62] ss:$0 sm:$0xff]  ;;  %v244_v54 = vld [vmem:[#allocation2 + $0x63] ss:$0 sm:$0xff]  ;;  %v245_v57 = vld [vmem:[#allocation2 + $0x60] ss:$0 sm:$0xff] }
   0xe   :  { %180 = vmatpush.msra.mxu2 %v39_v13  ;;  %v246_v61 = vld [vmem:[#allocation2 + $0x64] ss:$0 sm:$0xff] }
   0xf   :  { %201 = vmatpush.msra.mxu3 %v48_v18 }
  0x11   :  { %229 = vmatmul.msk.f32.gmra.mxu0 %vm54_vm0, %v31_v3  ;;  %128 = vperm.xlu0 %241, %v35_v7  }
  0x12   :  { %202 = vmatpush.msra.mxu3 %v47_v21 }
  0x14   :  { %203 = vmatpush.msra.mxu3 %v46_v23 }
  0x16   :  { %204 = vmatpush.msra.mxu3 %v45_v47 }
  0x18   :  { %205 = vmatpush.msra.mxu3 %v44_v48 }
  0x1a   :  { %206 = vmatpush.msra.mxu3 %v43_v49 }
  0x7b   :  { %v124_v20 = vpop.permute.xlu0 %123 }
  0x7c   :  { %v154_v42 = vpop.permute.xlu1 %153 }
  0x83   :  { %v129_v31 = vpop.permute.xlu0 %128 }
  0x86   :  { %v78_v9 = vpop.f32.mrf.mxu0 }
  0x87   :  { %231 = vmatmul.msk.f32.vlgmr.msra.gmra.mxu1 %vm85_vm2, %v78_v9 }
  0x8e   :  { %v81_v10 = vpop.f32.mrf.mxu0 }
  0x8f   :  { %232 = vmatmul.msk.f32.gmra.mxu1 %vm85_vm2, %v81_v10 }
 0x104   :  { %v113_v17 = vpop.f32.mrf.mxu1 }
 0x105   :  { %v114_v19 = vadd.f32 %v242_v14, %v113_v17 }
 0x107   :  { %v119_v22 = vmax.f32 %v114_v19, 0.0 }
 0x109   :  { %v131_v24 = vmul.f32 %v124_v20, %v119_v22 }
 0x10b   :  { %v133_v25 = vsel %vm54_vm0, %v131_v24, 0.0 }
 0x10c   :  { %v134_v26 = vrot.slane %v133_v25, 4  ;;  %v116_v27 = vpop.f32.mrf.mxu1 }
 0x10d   :  { %v117_v28 = vadd.f32 %v242_v14, %v116_v27 }
 0x10e   :  { %v135_v29 = vadd.f32 %v134_v26, %v133_v25 }
 0x10f   :  { %v120_v30 = vmax.f32 %v117_v28, 0.0 }
 0x110   :  { %v136_v33 = vrot.slane %v135_v29, 2 }
 0x111   :  { %v132_v32 = vmul.f32 %v129_v31, %v120_v30 }
 0x112   :  { %v137_v36 = vadd.f32 %v136_v33, %v135_v29 }
 0x113   :  { %v140_v34 = vsel %vm54_vm0, %v132_v32, 0.0 }
 0x114   :  { %v141_v35 = vrot.slane %v140_v34, 4  ;;  %v138_v39 = vrot.slane %v137_v36, 1 }
 0x116   :  { %v142_v37 = vadd.f32 %v141_v35, %v140_v34  ;;  %v139_v43 = vadd.f32 %v138_v39, %v137_v36 }
 0x118   :  { %v143_v38 = vrot.slane %v142_v37, 2 }
 0x11a   :  { %v144_v40 = vadd.f32 %v143_v38, %v142_v37 }
 0x11c   :  { %v145_v41 = vrot.slane %v144_v40, 1 }
 0x11e   :  { %v146_v44 = vadd.f32 %v145_v41, %v144_v40 }
 0x120   :  { %v150_v45 = vsel %vm149_vm3, %v146_v44, %v139_v43 }
 0x121   :  { %v156_v46 = vsel %vm54_vm0, %v150_v45, %v154_v42 }
 0x122   :  { %234 = vmatmul.msk.f32.vlgmr.msra.gmra.mxu2 %vm158_vm4, %v156_v46 }
 0x1a5   :  { %v182_v51 = vpop.f32.mrf.mxu2 }
 0x1a6   :  { %v183_v52 = vadd.f32 %v243_v50, %v182_v51 }
 0x1a8   :  { %v185_v53 = vmax.f32 %v183_v52, 0.0 }
 0x1aa   :  { %235 = vmatmul.msk.f32.vlgmr.msra.gmra.mxu3 %vm187_vm5, %v185_v53 }
 0x22d   :  { %v208_v55 = vpop.f32.mrf.mxu3 }
 0x22e   :  { %v209_v56 = vadd.f32 %v244_v54, %v208_v55 }
 0x230   :  { %v211_v58 = vmax.f32 %v209_v56, 0.0 }
 0x232   :  { %v213_v59 = vmul.f32 %v245_v57, %v211_v58 }
 0x234   :  { %v215_v60 = vsel %vm214_vm6, %v213_v59, 0.0 }
 0x235   :  { %216 = vadd.xlane.f32.xlu1 %v215_v60 }
 0x2a8   :  { %v217_v62 = vpop.xlane.xlu1 %216 }
 0x2a9   :  { %v219_v63 = vadd.f32 %v246_v61, %v217_v62 }
 0x2ab   :  { %247 = vtanh.f32 %v219_v63 }
 0x2b1   :  { %v248_v0 = vpop.eup %247 }
 0x2b2   :  { %222 = vst.msk [vmem:[%s337_s3] sm:$0x3] %vm221_vm7, %v248_v0 }
 0x2b3   :  { %227 = vsyncpa [#allocation3], 1 }

</bundles_post_ra>
